<compile_context>
chip_gen: v7x
topology: tpu7x:2x2x1
jax: 0.10.0
libtpu: 0.0.40
codegen_flags: <defaults>
</compile_context>

<pallas_src>
import functools
import math

import numpy as np
import jax
import jax.numpy as jnp
from jax.experimental import pallas as pl
from jax.experimental.pallas import tpu as pltpu


# ----------------------------- Pallas kernel ------------------------------- #

def _mab_kernel(qd_ref, kd_ref, mk_ref,
                wq_ref, bq_ref, wkv_ref, bkv_ref, wo_ref, bo_ref,
                o_ref, *, num_heads, dim_head):
    """One batch element per grid step. All inputs already resident in VMEM.

    qd_ref : (Lq, dim_q) bf16   raw (zero-padded) dense query nodes
    kd_ref : (Lk, dim_k) bf16   raw (zero-padded) dense key/value nodes
    mk_ref : (1, Lk)     f32    key validity mask {0,1}
    w*_ref : pre-transposed bf16 weights; b*_ref: f32 biases (1, dout)
    o_ref  : (Lq, dim_v) f32    dense output (padded query rows = garbage,
                                discarded by the gather in the wrapper)
    """
    f32 = jnp.float32
    bf16 = jnp.bfloat16
    dim_v = num_heads * dim_head

    # ---- fused input projections (bf16 operands -> f32 accumulate on MXU) ----
    q_proj = jnp.dot(qd_ref[...], wq_ref[...],
                     preferred_element_type=f32) + bq_ref[...]           # (Lq, dim_v)
    kv = jnp.dot(kd_ref[...], wkv_ref[...],
                 preferred_element_type=f32) + bkv_ref[...]              # (Lk, 2*dim_v)
    k_proj = kv[:, :dim_v]
    v_proj = kv[:, dim_v:]

    # Additive key-padding bias: 0 for valid keys, -1e30 for padded ones.
    # (padded-key scores underflow to exactly 0 after exp -> no second mask pass)
    kbias = (mk_ref[...] - 1.0) * 1e30                                   # (1, Lk)

    # Fold the softmax scale into q once (f32), before the bf16 matmul cast.
    scale = 1.0 / math.sqrt(dim_head)
    q_bf = (q_proj * scale).astype(bf16)
    k_bf = k_proj.astype(bf16)
    v_bf = v_proj.astype(bf16)

    # ---- per-head attention; heads unrolled statically, lane slices static ----
    head_outs = []
    for h in range(num_heads):
        sl = slice(h * dim_head, (h + 1) * dim_head)
        qh = q_bf[:, sl]                                                 # (Lq, D)
        kh = k_bf[:, sl]                                                 # (Lk, D)
        vh = v_bf[:, sl]                                                 # (Lk, D)

        # scores = (qh * scale) @ kh^T  (contract last dims; NT matmul on the MXU)
        e = jax.lax.dot_general(qh, kh, (((1,), (1,)), ((), ())),
                                preferred_element_type=f32)              # (Lq, Lk)
        e = e + kbias
        m = jnp.max(e, axis=-1, keepdims=True)
        p = jnp.exp(e - m)                       # masked cols -> exactly 0
        s = jnp.sum(p, axis=-1, keepdims=True)
        alpha = p * pl.reciprocal(s, approx=True)

        oh = jnp.dot(alpha.astype(bf16), vh, preferred_element_type=f32)  # (Lq, D)
        head_outs.append(oh)

    # concat heads back onto the lane axis + residual (out + q_proj)
    x = jnp.concatenate(head_outs, axis=1) + q_proj                      # (Lq, dim_v)

    # ---- output projection: out + relu(out @ Wo^T + bo) ----
    hid = jnp.dot(x.astype(bf16), wo_ref[...],
                  preferred_element_type=f32) + bo_ref[...]
    o_ref[...] = (x + jnp.maximum(hid, 0.0)).astype(o_ref.dtype)


def fused_mab(qd, kd, mask_k, prep, *, num_heads, dim_head):
    """qd: (B,Lq,dim_q) bf16, kd: (B,Lk,dim_k) bf16, mask_k: (B,Lk) f32."""
    B, Lq, dim_q = qd.shape
    _, Lk, dim_k = kd.shape
    dim_v = num_heads * dim_head
    mk = mask_k[:, None, :]                                              # (B,1,Lk)

    kernel = functools.partial(_mab_kernel, num_heads=num_heads, dim_head=dim_head)
    return pl.pallas_call(
        kernel,
        out_shape=jax.ShapeDtypeStruct((B, Lq, dim_v), jnp.float32),
        grid=(B,),
        in_specs=[
            pl.BlockSpec((None, Lq, dim_q), lambda b: (b, 0, 0)),
            pl.BlockSpec((None, Lk, dim_k), lambda b: (b, 0, 0)),
            pl.BlockSpec((None, 1, Lk), lambda b: (b, 0, 0)),
            pl.BlockSpec((dim_q, dim_v), lambda b: (0, 0)),          # Wq^T
            pl.BlockSpec((1, dim_v), lambda b: (0, 0)),              # bq
            pl.BlockSpec((dim_k, 2 * dim_v), lambda b: (0, 0)),      # [Wk^T | Wv^T]
            pl.BlockSpec((1, 2 * dim_v), lambda b: (0, 0)),          # [bk | bv]
            pl.BlockSpec((dim_v, dim_v), lambda b: (0, 0)),          # Wo^T
            pl.BlockSpec((1, dim_v), lambda b: (0, 0)),              # bo
        ],
        out_specs=pl.BlockSpec((None, Lq, dim_v), lambda b: (b, 0, 0)),
        compiler_params=pltpu.CompilerParams(dimension_semantics=("parallel",)),
    )(qd, kd, mk, prep['WqT'], prep['bq'], prep['WkvT'], prep['bkv'],
      prep['WoT'], prep['bo'])


# ------------------------------ JAX glue ----------------------------------- #

def prepare_params(params):
    """One-time weight prep: transpose, concat K/V, cast matmul operands to bf16."""
    return {
        'WqT': params['Wq'].T.astype(jnp.bfloat16),
        'bq': params['bq'].reshape(1, -1).astype(jnp.float32),
        'WkvT': jnp.concatenate([params['Wk'].T, params['Wv'].T],
                                axis=1).astype(jnp.bfloat16),
        'bkv': jnp.concatenate([params['bk'], params['bv']]
                               ).reshape(1, -1).astype(jnp.float32),
        'WoT': params['Wo'].T.astype(jnp.bfloat16),
        'bo': params['bo'].reshape(1, -1).astype(jnp.float32),
    }


def to_dense_batch(x, batch, batch_size, max_len):
    """JAX equivalent of torch_geometric.utils.to_dense_batch (sorted batch vector)."""
    n, f = x.shape
    counts = jnp.zeros((batch_size,), jnp.int32).at[batch].add(1)
    offsets = jnp.concatenate(
        [jnp.zeros((1,), jnp.int32), jnp.cumsum(counts)[:-1].astype(jnp.int32)])
    pos = jnp.arange(n, dtype=jnp.int32) - offsets[batch]
    dense = jnp.zeros((batch_size, max_len, f), x.dtype).at[batch, pos].set(x)
    mask = jnp.zeros((batch_size, max_len), jnp.float32).at[batch, pos].set(1.0)
    return dense, mask, pos


def mab_forward(prep, q, k, batch_q, batch_k, *, num_heads, dim_head, B, Lq, Lk):
    # Dense-batch the RAW node features (data-dependent scatter; stays in XLA).
    qd, _mask_q, pos_q = to_dense_batch(q, batch_q, B, Lq)
    kd, mask_k, _ = to_dense_batch(k, batch_k, B, Lk)

    out_dense = fused_mab(qd.astype(jnp.bfloat16), kd.astype(jnp.bfloat16),
                          mask_k, prep, num_heads=num_heads, dim_head=dim_head)

    # Padded query rows contain garbage; this gather discards them
    # (matches the reference's out[mask_q == 1]).
    return out_dense[batch_q, pos_q]


def mab_reference(params, q, k, batch_q, batch_k, *, num_heads, dim_head, B, Lq, Lk):
    """Pure-JAX f32 reference replicating the PyTorch math."""
    dim_v = num_heads * dim_head
    qp = q @ params['Wq'].T + params['bq']
    kp = k @ params['Wk'].T + params['bk']
    vp = k @ params['Wv'].T + params['bv']
    qd, mq, pos_q = to_dense_batch(qp, batch_q, B, Lq)
    kd, mk, _ = to_dense_batch(kp, batch_k, B, Lk)
    vd, _, _ = to_dense_batch(vp, batch_k, B, Lk)
    qd = qd.reshape(B, Lq, num_heads, dim_head)
    kd = kd.reshape(B, Lk, num_heads, dim_head)
    vd = vd.reshape(B, Lk, num_heads, dim_head)
    e = jnp.einsum('bxhd,byhd->bhxy', qd, kd) / math.sqrt(dim_head)
    mask = (mq[:, None, :, None] * mk[:, None, None, :]) > 0
    e = jnp.where(mask, e, -jnp.inf)
    m = jnp.max(e, axis=-1, keepdims=True)
    m = jnp.where(jnp.isfinite(m), m, 0.0)
    p = jnp.exp(e - m)
    alpha = p / jnp.clip(jnp.sum(p, axis=-1, keepdims=True), 1e-30)
    alpha = jnp.where(mask, alpha, 0.0)
    out = jnp.einsum('bhxy,byhd->bxhd', alpha, vd) + qd
    out = out.reshape(B, Lq, dim_v)[batch_q, pos_q]
    h = out @ params['Wo'].T + params['bo']
    return out + jnp.maximum(h, 0.0)


# --------------------------------- main ------------------------------------ #

if __name__ == "__main__":
    dim_q, dim_k, dim_head, num_heads = 16, 16, 8, 4
    dim_v = dim_head * num_heads

    # Sorted batch assignment vectors (as torch_geometric assumes).
    batch_q_np = np.array([0] * 4 + [1] * 6, dtype=np.int32)   # 10 query nodes, B=2
    batch_k_np = np.array([0] * 5 + [1] * 7, dtype=np.int32)   # 12 key/value nodes
    assert np.all(np.diff(batch_q_np) >= 0) and np.all(np.diff(batch_k_np) >= 0), \
        "to_dense_batch assumes sorted batch vectors"
    B = int(batch_q_np.max()) + 1
    Lq = int(np.bincount(batch_q_np).max())
    Lk = int(np.bincount(batch_k_np).max())
    Lq = ((Lq + 7) // 8) * 8   # pad dense length for clean TPU sublane tiling
    Lk = ((Lk + 7) // 8) * 8   # (padded rows are masked / discarded -> result unchanged)

    key = jax.random.PRNGKey(0)
    ks = jax.random.split(key, 10)
    q = jax.random.normal(ks[0], (batch_q_np.shape[0], dim_q), jnp.float32)
    k = jax.random.normal(ks[1], (batch_k_np.shape[0], dim_k), jnp.float32)

    params = {
        'Wq': 0.1 * jax.random.normal(ks[2], (dim_v, dim_q), jnp.float32),
        'bq': 0.1 * jax.random.normal(ks[3], (dim_v,), jnp.float32),
        'Wk': 0.1 * jax.random.normal(ks[4], (dim_v, dim_k), jnp.float32),
        'bk': 0.1 * jax.random.normal(ks[5], (dim_v,), jnp.float32),
        'Wv': 0.1 * jax.random.normal(ks[6], (dim_v, dim_k), jnp.float32),
        'bv': 0.1 * jax.random.normal(ks[7], (dim_v,), jnp.float32),
        'Wo': 0.1 * jax.random.normal(ks[8], (dim_v, dim_v), jnp.float32),
        'bo': 0.1 * jax.random.normal(ks[9], (dim_v,), jnp.float32),
    }

    batch_q = jnp.asarray(batch_q_np)
    batch_k = jnp.asarray(batch_k_np)

    prep = prepare_params(params)   # one-time weight transpose / concat / bf16 cast
    fwd = jax.jit(functools.partial(mab_forward, num_heads=num_heads,
                                    dim_head=dim_head, B=B, Lq=Lq, Lk=Lk))

    out = jax.block_until_ready(fwd(prep, q, k, batch_q, batch_k))

    ref = mab_reference(params, q, k, batch_q, batch_k,
                        num_heads=num_heads, dim_head=dim_head, B=B, Lq=Lq, Lk=Lk)

    assert out.shape == (batch_q_np.shape[0], dim_v)
    # bf16 MXU operands + approx reciprocal -> compare against f32 reference loosely.
    np.testing.assert_allclose(np.asarray(out), np.asarray(ref), rtol=2e-2, atol=2e-2)
    print("KERNEL_OK")
</pallas_src>

<mosaic_0001>
module attributes {stable_mosaic.version = 11 : i64} {
  func.func @_mab_kernel(%arg0: i32, %arg1: memref<1x8x16xbf16, #tpu.memory_space<vmem>>, %arg2: memref<1x8x16xbf16, #tpu.memory_space<vmem>>, %arg3: memref<1x1x8xf32, #tpu.memory_space<vmem>>, %arg4: memref<16x32xbf16, #tpu.memory_space<vmem>>, %arg5: memref<1x32xf32, #tpu.memory_space<vmem>>, %arg6: memref<16x64xbf16, #tpu.memory_space<vmem>>, %arg7: memref<1x64xf32, #tpu.memory_space<vmem>>, %arg8: memref<32x32xbf16, #tpu.memory_space<vmem>>, %arg9: memref<1x32xf32, #tpu.memory_space<vmem>>, %arg10: memref<1x8x32xf32, #tpu.memory_space<vmem>>) attributes {dimension_semantics = [#tpu.dimension_semantics<parallel>], iteration_bounds = array<i64: 2>, scalar_prefetch = 0 : i64, scratch_operands = 0 : i64, tpu.core_type = #tpu.core_type<tc>, window_params = [{transform_indices = @transform_0, window_bounds = array<i64: 1, 8, 16>}, {transform_indices = @transform_1, window_bounds = array<i64: 1, 8, 16>}, {transform_indices = @transform_2, window_bounds = array<i64: 1, 1, 8>}, {pipeline_mode = #tpu.pipeline_mode<synchronous>, transform_indices = @transform_3, window_bounds = array<i64: 16, 32>}, {pipeline_mode = #tpu.pipeline_mode<synchronous>, transform_indices = @transform_4, window_bounds = array<i64: 1, 32>}, {pipeline_mode = #tpu.pipeline_mode<synchronous>, transform_indices = @transform_5, window_bounds = array<i64: 16, 64>}, {pipeline_mode = #tpu.pipeline_mode<synchronous>, transform_indices = @transform_6, window_bounds = array<i64: 1, 64>}, {pipeline_mode = #tpu.pipeline_mode<synchronous>, transform_indices = @transform_7, window_bounds = array<i64: 32, 32>}, {pipeline_mode = #tpu.pipeline_mode<synchronous>, transform_indices = @transform_8, window_bounds = array<i64: 1, 32>}, {transform_indices = @transform_9, window_bounds = array<i64: 1, 8, 32>}]} {
    %c0 = arith.constant 0 : index
    %c0_0 = arith.constant 0 : index
    %c0_1 = arith.constant 0 : index
    %0 = vector.load %arg1[%c0, %c0_0, %c0_1] : memref<1x8x16xbf16, #tpu.memory_space<vmem>>, vector<1x8x16xbf16>
    %1 = vector.shape_cast %0 : vector<1x8x16xbf16> to vector<8x16xbf16>
    %c0_2 = arith.constant 0 : index
    %c0_3 = arith.constant 0 : index
    %2 = vector.load %arg4[%c0_2, %c0_3] : memref<16x32xbf16, #tpu.memory_space<vmem>>, vector<16x32xbf16>
    %cst = arith.constant dense<0.000000e+00> : vector<8x32xf32>
    %3 = tpu.matmul %1, %2, %cst {dimension_numbers = #tpu.dot_dimension_numbers<[1], [0], [0], [1], [0, 0, 1, 1], [], []>} : vector<8x16xbf16>, vector<16x32xbf16>, vector<8x32xf32> -> vector<8x32xf32>
    %c0_4 = arith.constant 0 : index
    %c0_5 = arith.constant 0 : index
    %4 = vector.load %arg5[%c0_4, %c0_5] : memref<1x32xf32, #tpu.memory_space<vmem>>, vector<1x32xf32>
    %5 = vector.broadcast %4 : vector<1x32xf32> to vector<8x32xf32>
    %6 = arith.addf %3, %5 : vector<8x32xf32>
    %c0_6 = arith.constant 0 : index
    %c0_7 = arith.constant 0 : index
    %c0_8 = arith.constant 0 : index
    %7 = vector.load %arg2[%c0_6, %c0_7, %c0_8] : memref<1x8x16xbf16, #tpu.memory_space<vmem>>, vector<1x8x16xbf16>
    %8 = vector.shape_cast %7 : vector<1x8x16xbf16> to vector<8x16xbf16>
    %c0_9 = arith.constant 0 : index
    %c0_10 = arith.constant 0 : index
    %9 = vector.load %arg6[%c0_9, %c0_10] : memref<16x64xbf16, #tpu.memory_space<vmem>>, vector<16x64xbf16>
    %cst_11 = arith.constant dense<0.000000e+00> : vector<8x64xf32>
    %10 = tpu.matmul %8, %9, %cst_11 {dimension_numbers = #tpu.dot_dimension_numbers<[1], [0], [0], [1], [0, 0, 1, 1], [], []>} : vector<8x16xbf16>, vector<16x64xbf16>, vector<8x64xf32> -> vector<8x64xf32>
    %c0_12 = arith.constant 0 : index
    %c0_13 = arith.constant 0 : index
    %11 = vector.load %arg7[%c0_12, %c0_13] : memref<1x64xf32, #tpu.memory_space<vmem>>, vector<1x64xf32>
    %12 = vector.broadcast %11 : vector<1x64xf32> to vector<8x64xf32>
    %13 = arith.addf %10, %12 : vector<8x64xf32>
    %14 = vector.extract_strided_slice %13 {offsets = [0, 0], sizes = [8, 32], strides = [1, 1]} : vector<8x64xf32> to vector<8x32xf32>
    %15 = vector.extract_strided_slice %13 {offsets = [0, 32], sizes = [8, 32], strides = [1, 1]} : vector<8x64xf32> to vector<8x32xf32>
    %c0_14 = arith.constant 0 : index
    %c0_15 = arith.constant 0 : index
    %c0_16 = arith.constant 0 : index
    %16 = vector.load %arg3[%c0_14, %c0_15, %c0_16] : memref<1x1x8xf32, #tpu.memory_space<vmem>>, vector<1x1x8xf32>
    %17 = vector.shape_cast %16 : vector<1x1x8xf32> to vector<1x8xf32>
    %cst_17 = arith.constant 1.000000e+00 : f32
    %18 = vector.broadcast %cst_17 : f32 to vector<1x8xf32>
    %19 = arith.subf %17, %18 : vector<1x8xf32>
    %cst_18 = arith.constant 1.000000e+30 : f32
    %20 = vector.broadcast %cst_18 : f32 to vector<1x8xf32>
    %21 = arith.mulf %19, %20 : vector<1x8xf32>
    %cst_19 = arith.constant 0.353553385 : f32
    %22 = vector.broadcast %cst_19 : f32 to vector<8x32xf32>
    %23 = arith.mulf %6, %22 : vector<8x32xf32>
    %24 = arith.truncf %23 : vector<8x32xf32> to vector<8x32xbf16>
    %25 = arith.truncf %14 : vector<8x32xf32> to vector<8x32xbf16>
    %26 = arith.truncf %15 : vector<8x32xf32> to vector<8x32xbf16>
    %27 = vector.extract_strided_slice %24 {offsets = [0, 0], sizes = [8, 8], strides = [1, 1]} : vector<8x32xbf16> to vector<8x8xbf16>
    %28 = vector.extract_strided_slice %25 {offsets = [0, 0], sizes = [8, 8], strides = [1, 1]} : vector<8x32xbf16> to vector<8x8xbf16>
    %29 = vector.extract_strided_slice %26 {offsets = [0, 0], sizes = [8, 8], strides = [1, 1]} : vector<8x32xbf16> to vector<8x8xbf16>
    %cst_20 = arith.constant dense<0.000000e+00> : vector<8x8xf32>
    %30 = tpu.matmul %27, %28, %cst_20 {dimension_numbers = #tpu.dot_dimension_numbers<[1], [1], [0], [0], [0, 0, 1, 0], [], []>} : vector<8x8xbf16>, vector<8x8xbf16>, vector<8x8xf32> -> vector<8x8xf32>
    %31 = vector.broadcast %21 : vector<1x8xf32> to vector<8x8xf32>
    %32 = arith.addf %30, %31 : vector<8x8xf32>
    %cst_21 = arith.constant dense<0xFF800000> : vector<8xf32>
    %33 = vector.multi_reduction <maximumf>, %32, %cst_21 [1] : vector<8x8xf32> to vector<8xf32>
    %34 = vector.shape_cast %33 : vector<8xf32> to vector<8x1xf32>
    %35 = vector.broadcast %34 : vector<8x1xf32> to vector<8x8xf32>
    %36 = arith.subf %32, %35 : vector<8x8xf32>
    %37 = math.exp %36 : vector<8x8xf32>
    %cst_22 = arith.constant dense<0.000000e+00> : vector<8xf32>
    %38 = vector.multi_reduction <add>, %37, %cst_22 [1] : vector<8x8xf32> to vector<8xf32>
    %39 = vector.shape_cast %38 : vector<8xf32> to vector<8x1xf32>
    %40 = tpu.reciprocal %39 {approx = true} : vector<8x1xf32> -> vector<8x1xf32>
    %41 = vector.broadcast %40 : vector<8x1xf32> to vector<8x8xf32>
    %42 = arith.mulf %37, %41 : vector<8x8xf32>
    %43 = arith.truncf %42 : vector<8x8xf32> to vector<8x8xbf16>
    %cst_23 = arith.constant dense<0.000000e+00> : vector<8x8xf32>
    %44 = tpu.matmul %43, %29, %cst_23 {dimension_numbers = #tpu.dot_dimension_numbers<[1], [0], [0], [1], [0, 0, 1, 1], [], []>} : vector<8x8xbf16>, vector<8x8xbf16>, vector<8x8xf32> -> vector<8x8xf32>
    %45 = vector.extract_strided_slice %24 {offsets = [0, 8], sizes = [8, 8], strides = [1, 1]} : vector<8x32xbf16> to vector<8x8xbf16>
    %46 = vector.extract_strided_slice %25 {offsets = [0, 8], sizes = [8, 8], strides = [1, 1]} : vector<8x32xbf16> to vector<8x8xbf16>
    %47 = vector.extract_strided_slice %26 {offsets = [0, 8], sizes = [8, 8], strides = [1, 1]} : vector<8x32xbf16> to vector<8x8xbf16>
    %cst_24 = arith.constant dense<0.000000e+00> : vector<8x8xf32>
    %48 = tpu.matmul %45, %46, %cst_24 {dimension_numbers = #tpu.dot_dimension_numbers<[1], [1], [0], [0], [0, 0, 1, 0], [], []>} : vector<8x8xbf16>, vector<8x8xbf16>, vector<8x8xf32> -> vector<8x8xf32>
    %49 = vector.broadcast %21 : vector<1x8xf32> to vector<8x8xf32>
    %50 = arith.addf %48, %49 : vector<8x8xf32>
    %cst_25 = arith.constant dense<0xFF800000> : vector<8xf32>
    %51 = vector.multi_reduction <maximumf>, %50, %cst_25 [1] : vector<8x8xf32> to vector<8xf32>
    %52 = vector.shape_cast %51 : vector<8xf32> to vector<8x1xf32>
    %53 = vector.broadcast %52 : vector<8x1xf32> to vector<8x8xf32>
    %54 = arith.subf %50, %53 : vector<8x8xf32>
    %55 = math.exp %54 : vector<8x8xf32>
    %cst_26 = arith.constant dense<0.000000e+00> : vector<8xf32>
    %56 = vector.multi_reduction <add>, %55, %cst_26 [1] : vector<8x8xf32> to vector<8xf32>
    %57 = vector.shape_cast %56 : vector<8xf32> to vector<8x1xf32>
    %58 = tpu.reciprocal %57 {approx = true} : vector<8x1xf32> -> vector<8x1xf32>
    %59 = vector.broadcast %58 : vector<8x1xf32> to vector<8x8xf32>
    %60 = arith.mulf %55, %59 : vector<8x8xf32>
    %61 = arith.truncf %60 : vector<8x8xf32> to vector<8x8xbf16>
    %cst_27 = arith.constant dense<0.000000e+00> : vector<8x8xf32>
    %62 = tpu.matmul %61, %47, %cst_27 {dimension_numbers = #tpu.dot_dimension_numbers<[1], [0], [0], [1], [0, 0, 1, 1], [], []>} : vector<8x8xbf16>, vector<8x8xbf16>, vector<8x8xf32> -> vector<8x8xf32>
    %63 = vector.extract_strided_slice %24 {offsets = [0, 16], sizes = [8, 8], strides = [1, 1]} : vector<8x32xbf16> to vector<8x8xbf16>
    %64 = vector.extract_strided_slice %25 {offsets = [0, 16], sizes = [8, 8], strides = [1, 1]} : vector<8x32xbf16> to vector<8x8xbf16>
    %65 = vector.extract_strided_slice %26 {offsets = [0, 16], sizes = [8, 8], strides = [1, 1]} : vector<8x32xbf16> to vector<8x8xbf16>
    %cst_28 = arith.constant dense<0.000000e+00> : vector<8x8xf32>
    %66 = tpu.matmul %63, %64, %cst_28 {dimension_numbers = #tpu.dot_dimension_numbers<[1], [1], [0], [0], [0, 0, 1, 0], [], []>} : vector<8x8xbf16>, vector<8x8xbf16>, vector<8x8xf32> -> vector<8x8xf32>
    %67 = vector.broadcast %21 : vector<1x8xf32> to vector<8x8xf32>
    %68 = arith.addf %66, %67 : vector<8x8xf32>
    %cst_29 = arith.constant dense<0xFF800000> : vector<8xf32>
    %69 = vector.multi_reduction <maximumf>, %68, %cst_29 [1] : vector<8x8xf32> to vector<8xf32>
    %70 = vector.shape_cast %69 : vector<8xf32> to vector<8x1xf32>
    %71 = vector.broadcast %70 : vector<8x1xf32> to vector<8x8xf32>
    %72 = arith.subf %68, %71 : vector<8x8xf32>
    %73 = math.exp %72 : vector<8x8xf32>
    %cst_30 = arith.constant dense<0.000000e+00> : vector<8xf32>
    %74 = vector.multi_reduction <add>, %73, %cst_30 [1] : vector<8x8xf32> to vector<8xf32>
    %75 = vector.shape_cast %74 : vector<8xf32> to vector<8x1xf32>
    %76 = tpu.reciprocal %75 {approx = true} : vector<8x1xf32> -> vector<8x1xf32>
    %77 = vector.broadcast %76 : vector<8x1xf32> to vector<8x8xf32>
    %78 = arith.mulf %73, %77 : vector<8x8xf32>
    %79 = arith.truncf %78 : vector<8x8xf32> to vector<8x8xbf16>
    %cst_31 = arith.constant dense<0.000000e+00> : vector<8x8xf32>
    %80 = tpu.matmul %79, %65, %cst_31 {dimension_numbers = #tpu.dot_dimension_numbers<[1], [0], [0], [1], [0, 0, 1, 1], [], []>} : vector<8x8xbf16>, vector<8x8xbf16>, vector<8x8xf32> -> vector<8x8xf32>
    %81 = vector.extract_strided_slice %24 {offsets = [0, 24], sizes = [8, 8], strides = [1, 1]} : vector<8x32xbf16> to vector<8x8xbf16>
    %82 = vector.extract_strided_slice %25 {offsets = [0, 24], sizes = [8, 8], strides = [1, 1]} : vector<8x32xbf16> to vector<8x8xbf16>
    %83 = vector.extract_strided_slice %26 {offsets = [0, 24], sizes = [8, 8], strides = [1, 1]} : vector<8x32xbf16> to vector<8x8xbf16>
    %cst_32 = arith.constant dense<0.000000e+00> : vector<8x8xf32>
    %84 = tpu.matmul %81, %82, %cst_32 {dimension_numbers = #tpu.dot_dimension_numbers<[1], [1], [0], [0], [0, 0, 1, 0], [], []>} : vector<8x8xbf16>, vector<8x8xbf16>, vector<8x8xf32> -> vector<8x8xf32>
    %85 = vector.broadcast %21 : vector<1x8xf32> to vector<8x8xf32>
    %86 = arith.addf %84, %85 : vector<8x8xf32>
    %cst_33 = arith.constant dense<0xFF800000> : vector<8xf32>
    %87 = vector.multi_reduction <maximumf>, %86, %cst_33 [1] : vector<8x8xf32> to vector<8xf32>
    %88 = vector.shape_cast %87 : vector<8xf32> to vector<8x1xf32>
    %89 = vector.broadcast %88 : vector<8x1xf32> to vector<8x8xf32>
    %90 = arith.subf %86, %89 : vector<8x8xf32>
    %91 = math.exp %90 : vector<8x8xf32>
    %cst_34 = arith.constant dense<0.000000e+00> : vector<8xf32>
    %92 = vector.multi_reduction <add>, %91, %cst_34 [1] : vector<8x8xf32> to vector<8xf32>
    %93 = vector.shape_cast %92 : vector<8xf32> to vector<8x1xf32>
    %94 = tpu.reciprocal %93 {approx = true} : vector<8x1xf32> -> vector<8x1xf32>
    %95 = vector.broadcast %94 : vector<8x1xf32> to vector<8x8xf32>
    %96 = arith.mulf %91, %95 : vector<8x8xf32>
    %97 = arith.truncf %96 : vector<8x8xf32> to vector<8x8xbf16>
    %cst_35 = arith.constant dense<0.000000e+00> : vector<8x8xf32>
    %98 = tpu.matmul %97, %83, %cst_35 {dimension_numbers = #tpu.dot_dimension_numbers<[1], [0], [0], [1], [0, 0, 1, 1], [], []>} : vector<8x8xbf16>, vector<8x8xbf16>, vector<8x8xf32> -> vector<8x8xf32>
    %99 = tpu.concatenate %44, %62, %80, %98 in 1 : vector<8x8xf32>, vector<8x8xf32>, vector<8x8xf32>, vector<8x8xf32> -> vector<8x32xf32>
    %100 = arith.addf %99, %6 : vector<8x32xf32>
    %101 = arith.truncf %100 : vector<8x32xf32> to vector<8x32xbf16>
    %c0_36 = arith.constant 0 : index
    %c0_37 = arith.constant 0 : index
    %102 = vector.load %arg8[%c0_36, %c0_37] : memref<32x32xbf16, #tpu.memory_space<vmem>>, vector<32x32xbf16>
    %cst_38 = arith.constant dense<0.000000e+00> : vector<8x32xf32>
    %103 = tpu.matmul %101, %102, %cst_38 {dimension_numbers = #tpu.dot_dimension_numbers<[1], [0], [0], [1], [0, 0, 1, 1], [], []>} : vector<8x32xbf16>, vector<32x32xbf16>, vector<8x32xf32> -> vector<8x32xf32>
    %c0_39 = arith.constant 0 : index
    %c0_40 = arith.constant 0 : index
    %104 = vector.load %arg9[%c0_39, %c0_40] : memref<1x32xf32, #tpu.memory_space<vmem>>, vector<1x32xf32>
    %105 = vector.broadcast %104 : vector<1x32xf32> to vector<8x32xf32>
    %106 = arith.addf %103, %105 : vector<8x32xf32>
    %cst_41 = arith.constant 0.000000e+00 : f32
    %107 = vector.broadcast %cst_41 : f32 to vector<8x32xf32>
    %108 = arith.maximumf %106, %107 : vector<8x32xf32>
    %109 = arith.addf %100, %108 : vector<8x32xf32>
    %c0_42 = arith.constant 0 : index
    %c0_43 = arith.constant 0 : index
    %c0_44 = arith.constant 0 : index
    %110 = vector.load %arg10[%c0_42, %c0_43, %c0_44] : memref<1x8x32xf32, #tpu.memory_space<vmem>>, vector<1x8x32xf32>
    %111 = vector.shape_cast %110 : vector<1x8x32xf32> to vector<8x32xf32>
    %112 = vector.shape_cast %109 : vector<8x32xf32> to vector<1x8x32xf32>
    tpu.vector_store %arg10[%c0_42, %c0_43, %c0_44], %112 {strides = array<i32>} : memref<1x8x32xf32, #tpu.memory_space<vmem>>, vector<1x8x32xf32>,
    return
  }
  func.func @transform_0(%arg0: i32) -> (i32, i32, i32) {
    %c0_i32 = arith.constant 0 : i32
    %c0_i32_0 = arith.constant 0 : i32
    %c0_i32_1 = arith.constant 0 : i32
    return %arg0, %c0_i32, %c0_i32_0 : i32, i32, i32
  }
  func.func @transform_1(%arg0: i32) -> (i32, i32, i32) {
    %c0_i32 = arith.constant 0 : i32
    %c0_i32_0 = arith.constant 0 : i32
    %c0_i32_1 = arith.constant 0 : i32
    return %arg0, %c0_i32, %c0_i32_0 : i32, i32, i32
  }
  func.func @transform_2(%arg0: i32) -> (i32, i32, i32) {
    %c0_i32 = arith.constant 0 : i32
    %c0_i32_0 = arith.constant 0 : i32
    %c0_i32_1 = arith.constant 0 : i32
    return %arg0, %c0_i32, %c0_i32_0 : i32, i32, i32
  }
  func.func @transform_3(%arg0: i32) -> (i32, i32) {
    %c0_i32 = arith.constant 0 : i32
    %c0_i32_0 = arith.constant 0 : i32
    %c0_i32_1 = arith.constant 0 : i32
    return %c0_i32, %c0_i32_0 : i32, i32
  }
  func.func @transform_4(%arg0: i32) -> (i32, i32) {
    %c0_i32 = arith.constant 0 : i32
    %c0_i32_0 = arith.constant 0 : i32
    %c0_i32_1 = arith.constant 0 : i32
    return %c0_i32, %c0_i32_0 : i32, i32
  }
  func.func @transform_5(%arg0: i32) -> (i32, i32) {
    %c0_i32 = arith.constant 0 : i32
    %c0_i32_0 = arith.constant 0 : i32
    %c0_i32_1 = arith.constant 0 : i32
    return %c0_i32, %c0_i32_0 : i32, i32
  }
  func.func @transform_6(%arg0: i32) -> (i32, i32) {
    %c0_i32 = arith.constant 0 : i32
    %c0_i32_0 = arith.constant 0 : i32
    %c0_i32_1 = arith.constant 0 : i32
    return %c0_i32, %c0_i32_0 : i32, i32
  }
  func.func @transform_7(%arg0: i32) -> (i32, i32) {
    %c0_i32 = arith.constant 0 : i32
    %c0_i32_0 = arith.constant 0 : i32
    %c0_i32_1 = arith.constant 0 : i32
    return %c0_i32, %c0_i32_0 : i32, i32
  }
  func.func @transform_8(%arg0: i32) -> (i32, i32) {
    %c0_i32 = arith.constant 0 : i32
    %c0_i32_0 = arith.constant 0 : i32
    %c0_i32_1 = arith.constant 0 : i32
    return %c0_i32, %c0_i32_0 : i32, i32
  }
  func.func @transform_9(%arg0: i32) -> (i32, i32, i32) {
    %c0_i32 = arith.constant 0 : i32
    %c0_i32_0 = arith.constant 0 : i32
    %c0_i32_1 = arith.constant 0 : i32
    return %arg0, %c0_i32, %c0_i32_0 : i32, i32, i32
  }
}

</mosaic_0001>

<bundles_post_ra>
// kernel: mab_forward.1
= control target key start
LH: loop header
LB: loop body
LE: loop exit
PB: predicated region body
PF: predicated region fallthrough
CT: control target
= control target key end

     0   :  { %s1323_s30 = smov 0   ;;  %s1448_s0 = inlined_call_operand.vmem [shape: bf16[2,8,16], index: 0, kind: input, shape index: {}]   ;;  %s1449_s1 = inlined_call_operand.vmem [shape: bf16[2,8,16], index: 1, kind: input, shape index: {}]   ;;  %s1450_s2 = inlined_call_operand.vmem [shape: f32[2,1,8], index: 2, kind: input, shape index: {}]   ;;  %s1451_s3 = inlined_call_operand.vmem [shape: bf16[16,32], index: 3, kind: input, shape index: {}]   ;;  %s1452_s4 = inlined_call_operand.vmem [shape: f32[1,32], index: 4, kind: input, shape index: {}]   ;;  %s1453_s5 = inlined_call_operand.vmem [shape: bf16[16,64], index: 5, kind: input, shape index: {}]   ;;  %s1454_s6 = inlined_call_operand.vmem [shape: f32[1,64], index: 6, kind: input, shape index: {}]   ;;  %s1455_s7 = inlined_call_operand.vmem [shape: bf16[32,32], index: 7, kind: input, shape index: {}]   ;;  %s1456_s8 = inlined_call_operand.vmem [shape: f32[1,32], index: 8, kind: input, shape index: {}]   ;;  %s1457_s9 = inlined_call_operand.vmem [shape: f32[2,8,32], index: 9, kind: output, shape index: {}]  }
   0x1 LB: > { %s1093_s10 = sadd.s32 4294967295, %s1259_s30   ;;  %p1097_p0 = scmp.ge.s32.totalorder %s1259_s30, 1  ;;  %s1259_s30 = sphi %s1323_s30, %s19_s30  }
   0x2   : > { %p303_p1 = scmp.lt.s32.totalorder %s1259_s30, 3 }
   0x4   : > { %p304_p2 = pnand %p1097_p0, %p303_p1 }
   0x5   : > { %v1233_v0 = vld [vmem:[%s1453_s5] sm:$0xff] (!%p304_p2)   ;;  %v1261_v1 = vmov (!%p304_p2), 0.0   ;;  %vm1262_vm0 = vmmov (!%p304_p2), 0   ;;  %p344_p3 = scmp.lt.s32.totalorder (!%p304_p2), %s1093_s10, 1  ;;  %vm376_vm1 = vcmask (!%p304_p2), 130048   ;;  %vm491_vm2 = vcmask (!%p304_p2), 64512  }
   0x6   : > { %307 = sbr.rel (%p304_p2) target bundleno = 1462 (0x5b6), region = 56  ;;  %1151 = vmatprep.subr.bf16.mxu1 (!%p304_p2), %v1261_v1  ;;  %1145 = vmatprep.subr.bf16.mxu0 (!%p304_p2), %v1261_v1  ;;  %v1234_v2 = vld [vmem:[%s1451_s3] sm:$0xff] (!%p304_p2)   ;;  %s1263_s26 = smov (!%p304_p2), 112   ;;  %v486_v30 = vlaneseq (!%p304_p2)  ;;  %vm556_vm3 = vcmask (!%p304_p2), 1043456   ;;  %vm945_vm4 = vcmask (!%p304_p2), 195584   ;;  %vm972_vm5 = vcmask (!%p304_p2), 261120  }
   0x7   : > { %1152 = vmatpush3.bf16.msra.mxu1 (!%p304_p2), %v1233_v0  ;;  %1153 = vmatprep.mubr.msk.bf16.mxu1 (!%p304_p2), %vm1262_vm0, %v1261_v1  ;;  %v1104_v5 = vld [vmem:[%s1454_s6] ss:$0 sm:$0xff] (!%p304_p2)  ;;  %s1264_s27 = smov (!%p304_p2), 120   ;;  %s1265_s28 = smov (!%p304_p2), 104  }
   0x8   : > { %1146 = vmatpush3.bf16.msra.mxu0 (!%p304_p2), %v1234_v2  ;;  %1147 = vmatprep.mubr.msk.bf16.mxu0 (!%p304_p2), %vm1262_vm0, %v1261_v1  ;;  %v1101_v6 = vld [vmem:[%s1452_s4] ss:$0 sm:$0xff] (!%p304_p2)  ;;  %v487_v33 = vshrl.u32 (!%p304_p2), %v486_v30, 7  ;;  %s1266_s13 = smov (!%p304_p2), 96   ;;  %s1267_s14 = smov (!%p304_p2), 80  }
   0x9   : > { %1157 = vmatprep.subr.bf16.mxu0 (!%p304_p2), %v1261_v1  ;;  %1163 = vmatprep.subr.bf16.mxu1 (!%p304_p2), %v1261_v1  ;;  %s1269_s16 = smov (!%p304_p2), 88   ;;  %s1270_s19 = smov (!%p304_p2), 8  }
   0xa   : > { %v488_v35 = vsub.s32 (!%p304_p2), 0, %v487_v33  ;;  %s1271_s22 = smov (!%p304_p2), 16   ;;  %s1272_s23 = smov (!%p304_p2), 24  }
   0xd   : > { %s1459_s10 = smov (!%p344_p3, %s1093_s10), 1 }
   0xe   : > { %s1098_s15 = sshll.u32 %s1459_s10, 2  ;;  %s354_s12 = scalar_lea.vmem %s1450_s2, %s1459_s10 }
   0xf   : > { %s351_s18 = scalar_lea.vmem %s1449_s1, %s1098_s15  ;;  %s347_s21 = scalar_lea.vmem %s1448_s0, %s1098_s15  ;;  %v479_v31 = vld [vmem:[%s354_s12] sm:$0x1] }
  0x10   : > { %v420_v3 = vld [vmem:[%s351_s18] sm:$0xf]  ;;  %v1107_v32 = vadd.f32 -1.0, %v479_v31  ;;  %s1268_s15 = smov 72  }
  0x11   : > { %v360_v4 = vld [vmem:[%s347_s21] sm:$0xf]  ;;  %1154 = vmatmul.mubr.msk.bf16.vlgmr.msra.gmra.mrb[0].mxu1 %vm376_vm1, %v420_v3 }
  0x12   : > { %1148 = vmatmul.mubr.msk.bf16.vlgmr.msra.gmra.mrb[0].mxu0 %vm376_vm1, %v360_v4  ;;  %1165 = vmatprep.mubr.msk.bf16.mxu1 %vm1262_vm0, %v1261_v1  ;;  %v481_v34 = vmul.f32 1e+30, %v1107_v32 }
  0x13   : > { %1159 = vmatprep.mubr.msk.bf16.mxu0 %vm1262_vm0, %v1261_v1 }
  0x14   : > { %v489_v36 = vrot.slane %v481_v34, %v488_v35 }
  0xe4   : > { %v473_v7 = vpop.f32.mrb[0].mxu1 }
  0xe5   : > { %v414_v8 = vpop.f32.mrb[0].mxu0  ;;  %v474_v9 = vadd.f32 %v1104_v5, %v473_v7  ;;  %v1155_v10 = vpop.f32.mrb[1].mxu1 }
  0xe6   : > { %v1366_v11 = vadd.f32 %v1101_v6, %v414_v8  ;;  %v1149_v12 = vpop.f32.mrb[1].mxu0  ;;  %v476_v13 = vpop.f32.mrb[2].mxu1 }
  0xe7   : > { %v417_v14 = vpop.f32.mrb[2].mxu0  ;;  %v1368_v15 = vpack.c.bf16 %v474_v9, %v474_v9  ;;  %v1156_v17 = vpop.f32.mrb[3].mxu1 }
  0xe8   : > { %v482_v16 = vmul.f32 0.35355338, %v1366_v11  ;;  %v1150_v18 = vpop.f32.mrb[3].mxu0 }
  0xe9   : > { %713 = vrot.lane.b32.xlu1 %v1368_v15, %s1263_s26  ;;  %603 = vrot.lane.b32.xlu0 %v1368_v15, %s1264_s27  ;;  %v496_v20 = vsel %vm491_vm2, %v1368_v15, 0 }
  0xea   : > { %v483_v19 = vpack.c.bf16 %v482_v16, %v482_v16  ;;  %1158 = vmatpush3.bf16.xpose.msra.mxu0 %v496_v20 }
  0xeb   : > { %1169 = vmatprep.subr.bf16.mxu0 %v1261_v1 }
  0xed   : > { %711 = vrot.lane.b32.xlu1 %v483_v19, %s1263_s26  ;;  %601 = vrot.lane.b32.xlu0 %v483_v19, %s1264_s27  ;;  %s1100_s26 = sshll.u32 %s1459_s10, 3 }
  0xee   : > { %s358_s29 = scalar_lea.vmem %s1457_s9, %s1100_s26 }
  0xf1   : > { %821 = vrot.lane.b32.xlu1 %v483_v19, %s1265_s28  ;;  %823 = vrot.lane.b32.xlu0 %v1368_v15, %s1265_s28 }
  0xf2   : > { %1160 = vmatmul.mubr.msk.bf16.vlgmr.msra.gmra.mrb[4].mxu0 %vm491_vm2, %v483_v19 }
  0xf3   : > { %1171 = vmatprep.mubr.msk.bf16.mxu0 %vm1262_vm0, %v1261_v1 }
 0x15b   : > { %v604_v21 = vpop.permute.xlu0 %603  ;;  %v714_v23 = vpop.permute.xlu1 %713 }
 0x15c   : > { %v609_v22 = vsel %vm491_vm2, %v604_v21, 0  ;;  %v719_v25 = vsel %vm491_vm2, %v714_v23, 0 }
 0x15d   : > { %1170 = vmatpush3.bf16.xpose.msra.mxu0 %v609_v22 }
 0x15e   : > { %1181 = vmatprep.subr.bf16.mxu0 %v1261_v1 }
 0x15f   : > { %v602_v24 = vpop.permute.xlu0 %601  ;;  %v712_v27 = vpop.permute.xlu1 %711 }
 0x163   : > { %v824_v26 = vpop.permute.xlu0 %823  ;;  %v822_v29 = vpop.permute.xlu1 %821 }
 0x164   : > { %1172 = vmatmul.mubr.msk.bf16.vlgmr.msra.gmra.mrb[8].mxu0 %vm491_vm2, %v602_v24  ;;  %v829_v28 = vsel %vm491_vm2, %v824_v26, 0 }
 0x165   : > { %1182 = vmatpush3.bf16.xpose.msra.mxu0 %v719_v25  ;;  %1183 = vmatprep.mubr.msk.bf16.mxu0 %vm1262_vm0, %v1261_v1 }
 0x166   : > { %1193 = vmatprep.subr.bf16.mxu0 %v1261_v1 }
 0x16c   : > { %1184 = vmatmul.mubr.msk.bf16.vlgmr.msra.gmra.mrb[12].mxu0 %vm491_vm2, %v712_v27 }
 0x16d   : > { %1194 = vmatpush3.bf16.xpose.msra.mxu0 %v829_v28  ;;  %1195 = vmatprep.mubr.msk.bf16.mxu0 %vm1262_vm0, %v1261_v1 }
 0x16e   : > { %1205 = vmatprep.subr.bf16.mxu0 %v1261_v1 }
 0x174   : > { %1196 = vmatmul.mubr.msk.bf16.vlgmr.msra.gmra.mrb[16].mxu0 %vm491_vm2, %v822_v29 }
 0x175   : > { %1209 = vmatprep.mubr.msk.bf16.mxu0 %vm1262_vm0, %v1261_v1 }
 0x1c5   : > { %v532_v37 = vpop.f32.mrb[4].mxu0 }
 0x1c6   : > { %v533_v38 = vadd.f32 %v532_v37, %v489_v36  ;;  %v1161_v39 = vpop.f32.mrb[5].mxu0 }
 0x1c7   : > { %v535_v40 = vpop.f32.mrb[6].mxu0 }
 0x1c8   : > { %v1162_v41 = vpop.f32.mrb[7].mxu0  ;;  %v538_v42 = vsel %vm491_vm2, %v533_v38, -inf }
 0x1c9   : > { %539 = vmax.xlane.f32.xlu0 %v538_v42 }
 0x237   : > { %v645_v43 = vpop.f32.mrb[8].mxu0 }
 0x238   : > { %v646_v44 = vadd.f32 %v645_v43, %v489_v36  ;;  %v1173_v45 = vpop.f32.mrb[9].mxu0 }
 0x239   : > { %v648_v46 = vpop.f32.mrb[10].mxu0 }
 0x23a   : > { %v1174_v47 = vpop.f32.mrb[11].mxu0  ;;  %v651_v48 = vsel %vm491_vm2, %v646_v44, -inf }
 0x23b   : > { %652 = vmax.xlane.f32.xlu1 %v651_v48  ;;  %v1235_v47 = vld [vmem:[%s1455_s7] sm:$0xff]  }
 0x23c   : > { %1206 = vmatpush3.bf16.msra.mxu0 %v1235_v47 }
 0x23d   : > { %1207 = vmatprep.subr.bf16.mxu0 %v1261_v1 }
 0x23f   : > { %v755_v49 = vpop.f32.mrb[12].mxu0 }
 0x240   : > { %v756_v50 = vadd.f32 %v755_v49, %v489_v36  ;;  %v1185_v51 = vpop.f32.mrb[13].mxu0 }
 0x241   : > { %v758_v52 = vpop.f32.mrb[14].mxu0 }
 0x242   : > { %v1186_v53 = vpop.f32.mrb[15].mxu0  ;;  %v761_v54 = vsel %vm491_vm2, %v756_v50, -inf  ;;  %v1236_v52 = vld [vmem:[%s1455_s7 + $0x8] sm:$0xff]  }
 0x243   : > { %762 = vmax.xlane.f32.xlu0 %v761_v54  ;;  %1208 = vmatpush3.bf16.msra.mxu0 %v1236_v52 }
 0x247   : > { %v865_v55 = vpop.f32.mrb[16].mxu0 }
 0x248   : > { %v866_v56 = vadd.f32 %v865_v55, %v489_v36  ;;  %v1197_v57 = vpop.f32.mrb[17].mxu0 }
 0x249   : > { %v868_v58 = vpop.f32.mrb[18].mxu0 }
 0x24a   : > { %v1198_v59 = vpop.f32.mrb[19].mxu0  ;;  %v871_v60 = vsel %vm491_vm2, %v866_v56, -inf }
 0x24b   : > { %872 = vmax.xlane.f32.xlu0 %v871_v60 }
 0x256   : > { %v540_v61 = vpop.xlane.xlu0 %539 }
 0x257   : > { %v541_v62 = vsub.f32 %v533_v38, %v540_v61 }
 0x259   : > { %v542_v63 = vmul.f32 1.442695, %v541_v62 }
 0x25b   : > { %1237 = vpow2.f32 %v542_v63 }
 0x265   : > { %v1238_v0 = vpop.eup %1237 }
 0x266   : > { %v544_v2 = vsel %vm491_vm2, %v1238_v0, 0.0 }
 0x267   : > { %545 = vadd.xlane.f32.xlu1 %v544_v2 }
 0x278   : > { %551 = vrot.lane.b32.xlu1 %v1368_v15, %s1266_s13 }
 0x2c8   : > { %v653_v3 = vpop.xlane.xlu1 %652 }
 0x2c9   : > { %v654_v4 = vsub.f32 %v646_v44, %v653_v3 }
 0x2cb   : > { %v655_v5 = vmul.f32 1.442695, %v654_v4 }
 0x2cd   : > { %1239 = vpow2.f32 %v655_v5  ;;  %v1116_v5 = vld [vmem:[%s1456_s8] ss:$0 sm:$0xff] }
 0x2d0   : > { %v763_v6 = vpop.xlane.xlu0 %762 }
 0x2d1   : > { %v764_v7 = vsub.f32 %v756_v50, %v763_v6 }
 0x2d3   : > { %v765_v8 = vmul.f32 1.442695, %v764_v7 }
 0x2d5   : > { %1241 = vpow2.f32 %v765_v8 }
 0x2d7   : > { %v1240_v9 = vpop.eup %1239 }
 0x2d8   : > { %v873_v10 = vpop.xlane.xlu0 %872  ;;  %v657_v12 = vsel %vm491_vm2, %v1240_v9, 0.0 }
 0x2d9   : > { %v874_v13 = vsub.f32 %v866_v56, %v873_v10  ;;  %658 = vadd.xlane.f32.xlu0 %v657_v12 }
 0x2db   : > { %v875_v14 = vmul.f32 1.442695, %v874_v13 }
 0x2dd   : > { %1243 = vpow2.f32 %v875_v14 }
 0x2df   : > { %v1242_v16 = vpop.eup %1241 }
 0x2e0   : > { %v767_v17 = vsel %vm491_vm2, %v1242_v16, 0.0 }
 0x2e1   : > { %768 = vadd.xlane.f32.xlu1 %v767_v17 }
 0x2e7   : > { %v1244_v18 = vpop.eup %1243 }
 0x2e8   : > { %v877_v19 = vsel %vm491_vm2, %v1244_v18, 0.0 }
 0x2e9   : > { %878 = vadd.xlane.f32.xlu0 %v877_v19 }
 0x2f2   : > { %773 = vrot.lane.b32.xlu1 %v1368_v15, %s1267_s14 }
 0x2f4   : > { %v546_v20 = vpop.xlane.xlu1 %545 }
 0x2f5   : > { %1245 = vrcp.f32 %v546_v20 }
 0x2f6   : > { %883 = vrot.lane.b32.xlu1 %v1368_v15, %s1268_s15 }
 0x2f8   : > { %v552_v21 = vpop.permute.xlu1 %551 }
 0x2f9   : > { %v558_v22 = vsel %vm556_vm3, %v552_v21, 0 }
 0x2fa   : > { %1164 = vmatpush3.bf16.msra.mxu1 %v558_v22 }
 0x2fb   : > { %1175 = vmatprep.subr.bf16.mxu1 %v1261_v1 }
 0x2ff   : > { %v1246_v23 = vpop.eup %1245  ;;  %663 = vrot.lane.b32.xlu0 %v1368_v15, %s1269_s16 }
 0x300   : > { %v548_v24 = vmul.f32 %v1246_v23, %v1238_v0 }
 0x302   : > { %v549_v25 = vpack.c.bf16 %v548_v24, %v548_v24 }
 0x304   : > { %1166 = vmatmul.mubr.msk.bf16.vlgmr.msra.gmra.mrb[4].mxu1 %vm491_vm2, %v549_v25 }
 0x305   : > { %1177 = vmatprep.mubr.msk.bf16.mxu1 %vm1262_vm0, %v1261_v1 }
 0x366   : > { %v659_v26 = vpop.xlane.xlu0 %658 }
 0x367   : > { %1247 = vrcp.f32 %v659_v26 }
 0x36e   : > { %v769_v27 = vpop.xlane.xlu1 %768 }
 0x36f   : > { %1249 = vrcp.f32 %v769_v27 }
 0x371   : > { %v1248_v28 = vpop.eup %1247 }
 0x372   : > { %v661_v30 = vmul.f32 %v1248_v28, %v1240_v9  ;;  %v774_v33 = vpop.permute.xlu1 %773 }
 0x373   : > { %v779_v35 = vsel %vm556_vm3, %v774_v33, 0 }
 0x374   : > { %v662_v15 = vpack.c.bf16 %v661_v30, %v661_v30 }
 0x376   : > { %v879_v29 = vpop.xlane.xlu0 %878  ;;  %v884_v37 = vpop.permute.xlu1 %883 }
 0x377   : > { %1251 = vrcp.f32 %v879_v29  ;;  %v889_v40 = vsel %vm556_vm3, %v884_v37, 0 }
 0x379   : > { %v1250_v34 = vpop.eup %1249 }
 0x37a   : > { %v664_v31 = vpop.permute.xlu0 %663  ;;  %v771_v36 = vmul.f32 %v1250_v34, %v1242_v16 }
 0x37b   : > { %v669_v32 = vsel %vm556_vm3, %v664_v31, 0 }
 0x37c   : > { %1176 = vmatpush3.bf16.msra.mxu1 %v669_v32  ;;  %v772_v38 = vpack.c.bf16 %v771_v36, %v771_v36 }
 0x37d   : > { %1187 = vmatprep.subr.bf16.mxu1 %v1261_v1 }
 0x37f   : > { %1178 = vmatmul.mubr.msk.bf16.vlgmr.msra.gmra.mrb[8].mxu1 %vm491_vm2, %v662_v15 }
 0x380   : > { %1188 = vmatpush3.bf16.msra.mxu1 %v779_v35  ;;  %1189 = vmatprep.mubr.msk.bf16.mxu1 %vm1262_vm0, %v1261_v1 }
 0x381   : > { %1199 = vmatprep.subr.bf16.mxu1 %v1261_v1  ;;  %v1252_v39 = vpop.eup %1251 }
 0x382   : > { %v881_v41 = vmul.f32 %v1252_v39, %v1244_v18 }
 0x384   : > { %v882_v42 = vpack.c.bf16 %v881_v41, %v881_v41 }
 0x387   : > { %1190 = vmatmul.mubr.msk.bf16.vlgmr.msra.gmra.mrb[12].mxu1 %vm491_vm2, %v772_v38 }
 0x388   : > { %1200 = vmatpush3.bf16.msra.mxu1 %v889_v40  ;;  %1201 = vmatprep.mubr.msk.bf16.mxu1 %vm1262_vm0, %v1261_v1 }
 0x38f   : > { %1202 = vmatmul.mubr.msk.bf16.vlgmr.msra.gmra.mrb[16].mxu1 %vm491_vm2, %v882_v42 }
 0x3d7   : > { %v594_v43 = vpop.f32.mrb[4].mxu1 }
 0x3d8   : > { %v1167_v44 = vpop.f32.mrb[5].mxu1 }
 0x3d9   : > { %v597_v45 = vpop.f32.mrb[6].mxu1 }
 0x3da   : > { %v1168_v46 = vpop.f32.mrb[7].mxu1 }
 0x452   : > { %v705_v48 = vpop.f32.mrb[8].mxu1 }
 0x453   : > { %932 = vrot.lane.b32.xlu0 %v705_v48, %s1270_s19  ;;  %v1179_v49 = vpop.f32.mrb[9].mxu1 }
 0x454   : > { %v708_v50 = vpop.f32.mrb[10].mxu1 }
 0x455   : > { %v1180_v51 = vpop.f32.mrb[11].mxu1 }
 0x45a   : > { %v815_v53 = vpop.f32.mrb[12].mxu1 }
 0x45b   : > { %936 = vrot.lane.b32.xlu1 %v815_v53, %s1271_s22  ;;  %v1191_v54 = vpop.f32.mrb[13].mxu1 }
 0x45c   : > { %v818_v55 = vpop.f32.mrb[14].mxu1 }
 0x45d   : > { %v1192_v56 = vpop.f32.mrb[15].mxu1 }
 0x462   : > { %v925_v57 = vpop.f32.mrb[16].mxu1 }
 0x463   : > { %940 = vrot.lane.b32.xlu0 %v925_v57, %s1272_s23  ;;  %v1203_v1 = vpop.f32.mrb[17].mxu1 }
 0x464   : > { %v928_v58 = vpop.f32.mrb[18].mxu1 }
 0x465   : > { %v1204_v59 = vpop.f32.mrb[19].mxu1 }
 0x4c5   : > { %v933_v60 = vpop.permute.xlu0 %932 }
 0x4c6   : > { %v943_v62 = vsel %vm491_vm2, %v594_v43, %v933_v60 }
 0x4cd   : > { %v937_v61 = vpop.permute.xlu1 %936 }
 0x4ce   : > { %v944_v63 = vsel %vm376_vm1, %v943_v62, %v937_v61 }
 0x4d5   : > { %v941_v0 = vpop.permute.xlu0 %940 }
 0x4d6   : > { %v946_v2 = vsel %vm945_vm4, %v944_v63, %v941_v0 }
 0x4d7   : > { %v947_v3 = vadd.f32 %v946_v2, %v1366_v11 }
 0x4d9   : > { %v948_v4 = vpack.c.bf16 %v947_v3, %v947_v3 }
 0x4db   : > { %1210 = vmatmul.mubr.msk.bf16.vlgmr.msra.gmra.mrb[20].mxu0 %vm972_vm5, %v948_v4 }
 0x5ae   : > { %v1010_v6 = vpop.f32.mrb[20].mxu0 }
 0x5af   : > { %v1011_v7 = vadd.f32 %v1116_v5, %v1010_v6  ;;  %v1211_v8 = vpop.f32.mrb[21].mxu0 }
 0x5b0   : > { %v1013_v9 = vpop.f32.mrb[22].mxu0 }
 0x5b1   : > { %v1016_v10 = vmax.f32 %v1011_v7, 0.0  ;;  %v1212_v12 = vpop.f32.mrb[23].mxu0 }
 0x5b3   : > { %v1017_v13 = vadd.f32 %v1016_v10, %v947_v3 }
 0x5b5   : > { %1018 = vst.msk [vmem:[%s358_s29] sm:$0xff] %vm972_vm5, %v1017_v13 }
 0x5b6 PF: > { %s19_s30 = sadd.s32 1, %s1259_s30  }
 0x5b7   : > { %p16_p4 = scmp.ge.s32.totalorder %s19_s30, 4  }
 0x5b9   :  { %18 = sbr.rel (!%p16_p4) target bundleno = 1 (0x1), region = 92 }

</bundles_post_ra>
